<compile_context>
chip_gen: v6e
topology: v6e:2x2x1
jax: 0.10.0
libtpu: 0.0.40
codegen_flags: <defaults>
</compile_context>

<pallas_src>
import functools

import jax
import jax.numpy as jnp
from jax import lax
from jax.experimental import pallas as pl
from jax.experimental.pallas import tpu as pltpu

KSIZE = 5            # conv2 kernel width
PAD = 2              # conv2 padding
LANE = 128           # TPU lane width
_VMEM_TARGET = 20 * 1024 * 1024      # keep the per-step working set v7x-safe
_VMEM_LIMIT = 32 * 1024 * 1024


def _round_up(v, m):
    return (v + m - 1) // m * m


def _vmem_estimate(tile_l, c_in, c_pad, c_out, itemsize):
    blocks = (2 * (c_in * tile_l + 2 * c_in * LANE)     # double-buffered inputs
              + 2 * c_out * tile_l                      # double-buffered output
              + 2 * c_out * KSIZE * c_pad)              # weight block
    scratch = KSIZE * c_pad * tile_l                    # im2col stack
    transient = 6 * c_in * tile_l                       # tap temporaries (f32)
    return (blocks + scratch) * itemsize + transient * 4


def _fused_conv_kernel(x_ref, xprev_ref, xnext_ref, w_ref, o_ref, stack_ref, *,
                       n_tiles, tile_l, c_in, c_pad, l_valid):
    """One fused (conv1 -> conv2 -> conv3) output tile = one MXU matmul.

    Grid = (N, n_tiles); every step is independent (both axes "parallel").
      x_ref     : (1, c_in, tile_l)    input tile j
      xprev_ref : (1, c_in, 128)       last 128 cols of tile j-1 (left halo)
      xnext_ref : (1, c_in, 128)       first 128 cols of tile j+1 (right halo)
      w_ref     : (c_out, KSIZE*c_pad) fused, sublane-padded weight
      stack_ref : (KSIZE*c_pad, tile_l) VMEM scratch for the im2col stack
    """
    j = pl.program_id(1)
    rem = l_valid - (n_tiles - 1) * tile_l          # valid cols in the last tile

    # Alignment-padding rows contribute 0 (their w_fused columns are 0) but must
    # hold finite values -> zero them every step (a handful of vreg stores).
    if c_pad != c_in:
        zpad = jnp.zeros((c_pad - c_in, tile_l), dtype=x_ref.dtype)
        for k in range(KSIZE):
            stack_ref[pl.ds(k * c_pad + c_in, c_pad - c_in), :] = zpad

    # ---- centre tap (d = 0).  Ragged-tail masking only runs on the last tile
    #      and only when L % tile_l != 0; interior tiles load unmasked.
    center = pl.ds(PAD * c_pad, c_in)
    xcur = x_ref[0]
    stack_ref[center, :] = xcur
    if rem != tile_l:
        @pl.when(j == n_tiles - 1)
        def _mask_ragged_tail():
            col = lax.broadcasted_iota(jnp.int32, (c_in, tile_l), 1)
            stack_ref[center, :] = jnp.where(col < rem, xcur,
                                             jnp.zeros_like(xcur))
        xcur = stack_ref[center, :]          # masked on the last tile only

    # ---- halos: only their first/last PAD lanes ever reach an output column.
    #      All masking here is on (c_in, 128) arrays -> off the hot path.
    xp128 = xprev_ref[0]
    xp128 = jnp.where(j > 0, xp128, jnp.zeros_like(xp128))
    col_h = lax.broadcasted_iota(jnp.int32, (c_in, LANE), 1)
    xn128 = xnext_ref[0]
    xn128 = jnp.where((j + 1) * tile_l + col_h < l_valid, xn128,
                      jnp.zeros_like(xn128))

    # ---- shifted taps (d = -2, -1, +1, +2), each written at an 8-sublane
    #      aligned row offset of the stack scratch.
    for k in range(KSIZE):
        d = k - PAD
        if d == 0:
            continue
        rows = pl.ds(k * c_pad, c_in)
        if d < 0:
            a = -d
            # out[:, m] = cur[:, m - a] for m >= a, previous tile's tail below.
            stack_ref[rows, :] = jnp.concatenate(
                [xp128[:, LANE - a:], xcur[:, :tile_l - a]], axis=1)
        else:
            # out[:, m] = cur[:, m + d] for m < TL - d, next tile's head above.
            stack_ref[rows, :] = jnp.concatenate(
                [xcur[:, d:], xn128[:, :d]], axis=1)

    # ---- the whole fused conv stack is a single MXU matmul.
    out = jnp.dot(w_ref[...], stack_ref[...], preferred_element_type=jnp.float32)
    o_ref[0] = out.astype(o_ref.dtype)


def base_forward(x, w1, w2, w3, stride=1, tile_l=None):
    """x: (N, C_in, L); w1: (C_s, C_in, 1); w2: (C_s, C_s, 5); w3: (C_out, C_s, 1)."""
    n, c_in, _ = x.shape
    c_out = w3.shape[0]
    cdtype = x.dtype
    isz = x.dtype.itemsize

    # conv1 is k=1 with stride s -> pure subsampling of L (see module TODO above).
    x_eff = x if stride == 1 else x[:, :, ::stride]
    l_out = x_eff.shape[2]

    # ---- pre-fuse the three convs (always in f32), pad taps to 8 sublanes ----
    c_pad = _round_up(c_in, 8)
    w1m = w1[:, :, 0].astype(jnp.float32)                    # (C_s, C_in)
    w3m = w3[:, :, 0].astype(jnp.float32)                    # (C_out, C_s)
    w2t = jnp.transpose(w2, (2, 0, 1)).astype(jnp.float32)   # (K, C_s, C_s)
    wk = jnp.einsum("oc,kcd,di->koi", w3m, w2t, w1m,
                    precision=lax.Precision.HIGHEST)          # (K, C_out, C_in)
    if c_pad != c_in:
        wk = jnp.pad(wk, ((0, 0), (0, 0), (0, c_pad - c_in)))
    w_fused = jnp.transpose(wk, (1, 0, 2)).reshape(c_out, KSIZE * c_pad)
    w_fused = w_fused.astype(cdtype)

    # ---- lane tiling: big tiles by default, shrunk to fit the VMEM budget ----
    if tile_l is None:
        tile_l = max(LANE, min(2048, _round_up(l_out, LANE)))
        while (tile_l > LANE and
               _vmem_estimate(tile_l, c_in, c_pad, c_out, isz) > _VMEM_TARGET):
            tile_l -= LANE
    assert tile_l % LANE == 0, "tile_l must be a multiple of 128"
    n_tiles = pl.cdiv(l_out, tile_l)
    bpt = tile_l // LANE
    n128 = pl.cdiv(l_out, LANE)

    kernel = functools.partial(_fused_conv_kernel, n_tiles=n_tiles, tile_l=tile_l,
                               c_in=c_in, c_pad=c_pad, l_valid=l_out)

    flops = 2 * n * n_tiles * tile_l * c_out * KSIZE * c_pad
    bytes_accessed = isz * (n * c_in * l_out                  # main input tiles
                            + 2 * n * n_tiles * c_in * LANE   # halo blocks
                            + n * c_out * l_out               # output
                            + c_out * KSIZE * c_pad)          # weight

    return pl.pallas_call(
        kernel,
        out_shape=jax.ShapeDtypeStruct((n, c_out, l_out), x.dtype),
        grid_spec=pltpu.PrefetchScalarGridSpec(
            num_scalar_prefetch=0,
            grid=(n, n_tiles),
            in_specs=[
                pl.BlockSpec((1, c_in, tile_l), lambda b, j: (b, 0, j)),
                pl.BlockSpec((1, c_in, LANE),
                             lambda b, j: (b, 0, jnp.maximum(j * bpt - 1, 0))),
                pl.BlockSpec((1, c_in, LANE),
                             lambda b, j: (b, 0, jnp.minimum((j + 1) * bpt,
                                                             n128 - 1))),
                # TODO(synk): pipeline_mode=pl.Buffered(1) would single-buffer this
                # grid-invariant weight block at production channel counts.
                pl.BlockSpec((c_out, KSIZE * c_pad), lambda b, j: (0, 0)),
            ],
            out_specs=pl.BlockSpec((1, c_out, tile_l), lambda b, j: (b, 0, j)),
            scratch_shapes=[pltpu.VMEM((KSIZE * c_pad, tile_l), cdtype)],
        ),
        compiler_params=pltpu.CompilerParams(
            dimension_semantics=("parallel", "parallel"),
            vmem_limit_bytes=_VMEM_LIMIT),
        cost_estimate=pl.CostEstimate(flops=int(flops), transcendentals=0,
                                      bytes_accessed=int(bytes_accessed)),
    )(x_eff, x_eff, x_eff, w_fused)


def reference_forward(x, w1, w2, w3, stride=1):
    """Pure-JAX reference matching PyTorch Conv1d semantics."""
    dn = ("NCH", "OIH", "NCH")
    h = lax.conv_general_dilated(x, w1, window_strides=(stride,), padding="VALID",
                                 dimension_numbers=dn, precision="highest")
    h = lax.conv_general_dilated(h, w2, window_strides=(1,), padding=[(PAD, PAD)],
                                 dimension_numbers=dn, precision="highest")
    h = lax.conv_general_dilated(h, w3, window_strides=(1,), padding="VALID",
                                 dimension_numbers=dn, precision="highest")
    return h


if __name__ == "__main__":
    key = jax.random.PRNGKey(0)

    def run_case(n, c_in, c_s, c_out, length, stride, tile_l, k):
        kx, k1, k2, k3 = jax.random.split(k, 4)
        x = jax.random.normal(kx, (n, c_in, length), dtype=jnp.float32)
        w1 = jax.random.normal(k1, (c_s, c_in, 1), dtype=jnp.float32) * 0.2
        w2 = jax.random.normal(k2, (c_s, c_s, KSIZE), dtype=jnp.float32) * 0.1
        w3 = jax.random.normal(k3, (c_out, c_s, 1), dtype=jnp.float32) * 0.2

        out = jax.block_until_ready(
            base_forward(x, w1, w2, w3, stride=stride, tile_l=tile_l))
        ref = jax.block_until_ready(
            reference_forward(x, w1, w2, w3, stride=stride))

        assert out.shape == ref.shape, (out.shape, ref.shape)
        max_err = float(jnp.max(jnp.abs(out - ref)))
        assert jnp.allclose(out, ref, rtol=1e-4, atol=2e-4), (
            "mismatch vs reference", max_err)

    k1, k2, k3 = jax.random.split(key, 3)
    # small config consistent with the module (single-tile path, default tile)
    run_case(n=2, c_in=4, c_s=8, c_out=16, length=16, stride=1, tile_l=None, k=k1)
    # multi-tile, evenly divisible: exercises the left/right halo blocks
    run_case(n=2, c_in=4, c_s=8, c_out=16, length=512, stride=1, tile_l=128, k=k2)
    # multi-tile, ragged last tile + strided conv1 + c_in not a multiple of 8
    run_case(n=2, c_in=3, c_s=8, c_out=5, length=1200, stride=2, tile_l=128, k=k3)

    print("KERNEL_OK")
</pallas_src>

<mosaic_0001>
module attributes {stable_mosaic.version = 11 : i64} {
  func.func @_fused_conv_kernel(%arg0: i32, %arg1: i32, %arg2: memref<1x4x128xf32, #tpu.memory_space<vmem>>, %arg3: memref<1x4x128xf32, #tpu.memory_space<vmem>>, %arg4: memref<1x4x128xf32, #tpu.memory_space<vmem>>, %arg5: memref<16x40xf32, #tpu.memory_space<vmem>>, %arg6: memref<1x16x128xf32, #tpu.memory_space<vmem>>, %arg7: memref<40x128xf32, #tpu.memory_space<vmem>>) attributes {dimension_semantics = [#tpu.dimension_semantics<parallel>, #tpu.dimension_semantics<parallel>], iteration_bounds = array<i64: 2, 1>, scalar_prefetch = 0 : i64, scratch_operands = 1 : i64, tpu.core_type = #tpu.core_type<tc>, window_params = [{transform_indices = @transform_0, window_bounds = array<i64: 1, 4, 128>}, {transform_indices = @transform_1, window_bounds = array<i64: 1, 4, 128>}, {transform_indices = @transform_2, window_bounds = array<i64: 1, 4, 128>}, {pipeline_mode = #tpu.pipeline_mode<synchronous>, transform_indices = @transform_3, window_bounds = array<i64: 16, 40>}, {transform_indices = @transform_4, window_bounds = array<i64: 1, 16, 128>}]} {
    %cst = arith.constant 0.000000e+00 : f32
    %0 = vector.broadcast %cst : f32 to vector<4x128xf32>
    %c4 = arith.constant 4 : index
    %c0 = arith.constant 0 : index
    %1 = vector.load %arg7[%c4, %c0] : memref<40x128xf32, #tpu.memory_space<vmem>>, vector<4x128xf32>
    tpu.vector_store %arg7[%c4, %c0], %0 {strides = array<i32>} : memref<40x128xf32, #tpu.memory_space<vmem>>, vector<4x128xf32>,
    %c12 = arith.constant 12 : index
    %c0_0 = arith.constant 0 : index
    %2 = vector.load %arg7[%c12, %c0_0] : memref<40x128xf32, #tpu.memory_space<vmem>>, vector<4x128xf32>
    tpu.vector_store %arg7[%c12, %c0_0], %0 {strides = array<i32>} : memref<40x128xf32, #tpu.memory_space<vmem>>, vector<4x128xf32>,
    %c20 = arith.constant 20 : index
    %c0_1 = arith.constant 0 : index
    %3 = vector.load %arg7[%c20, %c0_1] : memref<40x128xf32, #tpu.memory_space<vmem>>, vector<4x128xf32>
    tpu.vector_store %arg7[%c20, %c0_1], %0 {strides = array<i32>} : memref<40x128xf32, #tpu.memory_space<vmem>>, vector<4x128xf32>,
    %c28 = arith.constant 28 : index
    %c0_2 = arith.constant 0 : index
    %4 = vector.load %arg7[%c28, %c0_2] : memref<40x128xf32, #tpu.memory_space<vmem>>, vector<4x128xf32>
    tpu.vector_store %arg7[%c28, %c0_2], %0 {strides = array<i32>} : memref<40x128xf32, #tpu.memory_space<vmem>>, vector<4x128xf32>,
    %c36 = arith.constant 36 : index
    %c0_3 = arith.constant 0 : index
    %5 = vector.load %arg7[%c36, %c0_3] : memref<40x128xf32, #tpu.memory_space<vmem>>, vector<4x128xf32>
    tpu.vector_store %arg7[%c36, %c0_3], %0 {strides = array<i32>} : memref<40x128xf32, #tpu.memory_space<vmem>>, vector<4x128xf32>,
    %c0_4 = arith.constant 0 : index
    %c0_5 = arith.constant 0 : index
    %c0_6 = arith.constant 0 : index
    %6 = vector.load %arg2[%c0_4, %c0_5, %c0_6] : memref<1x4x128xf32, #tpu.memory_space<vmem>>, vector<1x4x128xf32>
    %7 = vector.shape_cast %6 : vector<1x4x128xf32> to vector<4x128xf32>
    %c16 = arith.constant 16 : index
    %c0_7 = arith.constant 0 : index
    %8 = vector.load %arg7[%c16, %c0_7] : memref<40x128xf32, #tpu.memory_space<vmem>>, vector<4x128xf32>
    tpu.vector_store %arg7[%c16, %c0_7], %7 {strides = array<i32>} : memref<40x128xf32, #tpu.memory_space<vmem>>, vector<4x128xf32>,
    %c0_i32 = arith.constant 0 : i32
    %9 = arith.cmpi eq, %arg1, %c0_i32 : i32
    %10 = arith.extui %9 : i1 to i32
    %c0_i32_8 = arith.constant 0 : i32
    %11 = arith.cmpi ne, %10, %c0_i32_8 : i32
    scf.if %11 {
      %51 = tpu.iota {dimensions = array<i32: 1>} : vector<4x128xi32>
      %c16_i32_33 = arith.constant 16 : i32
      %52 = vector.broadcast %c16_i32_33 : i32 to vector<4x128xi32>
      %53 = arith.cmpi slt, %51, %52 : vector<4x128xi32>
      %cst_34 = arith.constant 0.000000e+00 : f32
      %54 = vector.broadcast %cst_34 : f32 to vector<4x128xf32>
      %55 = arith.select %53, %7, %54 : vector<4x128xi1>, vector<4x128xf32>
      %c16_35 = arith.constant 16 : index
      %c0_36 = arith.constant 0 : index
      %56 = vector.load %arg7[%c16_35, %c0_36] : memref<40x128xf32, #tpu.memory_space<vmem>>, vector<4x128xf32>
      tpu.vector_store %arg7[%c16_35, %c0_36], %55 {strides = array<i32>} : memref<40x128xf32, #tpu.memory_space<vmem>>, vector<4x128xf32>,
    } else {
    }
    %c16_9 = arith.constant 16 : index
    %c0_10 = arith.constant 0 : index
    %12 = vector.load %arg7[%c16_9, %c0_10] : memref<40x128xf32, #tpu.memory_space<vmem>>, vector<4x128xf32>
    %c0_11 = arith.constant 0 : index
    %c0_12 = arith.constant 0 : index
    %c0_13 = arith.constant 0 : index
    %13 = vector.load %arg3[%c0_11, %c0_12, %c0_13] : memref<1x4x128xf32, #tpu.memory_space<vmem>>, vector<1x4x128xf32>
    %14 = vector.shape_cast %13 : vector<1x4x128xf32> to vector<4x128xf32>
    %c0_i32_14 = arith.constant 0 : i32
    %15 = arith.cmpi sgt, %arg1, %c0_i32_14 : i32
    %cst_15 = arith.constant 0.000000e+00 : f32
    %16 = vector.broadcast %cst_15 : f32 to vector<4x128xf32>
    %17 = arith.select %15, %14, %16 : vector<4x128xf32>
    %18 = tpu.iota {dimensions = array<i32: 1>} : vector<4x128xi32>
    %c0_16 = arith.constant 0 : index
    %c0_17 = arith.constant 0 : index
    %c0_18 = arith.constant 0 : index
    %19 = vector.load %arg4[%c0_16, %c0_17, %c0_18] : memref<1x4x128xf32, #tpu.memory_space<vmem>>, vector<1x4x128xf32>
    %20 = vector.shape_cast %19 : vector<1x4x128xf32> to vector<4x128xf32>
    %c1_i32 = arith.constant 1 : i32
    %21 = arith.addi %arg1, %c1_i32 : i32
    %c128_i32 = arith.constant 128 : i32
    %22 = arith.muli %21, %c128_i32 : i32
    %23 = vector.broadcast %22 : i32 to vector<4x128xi32>
    %24 = arith.addi %23, %18 : vector<4x128xi32>
    %c16_i32 = arith.constant 16 : i32
    %25 = vector.broadcast %c16_i32 : i32 to vector<4x128xi32>
    %26 = arith.cmpi slt, %24, %25 : vector<4x128xi32>
    %cst_19 = arith.constant 0.000000e+00 : f32
    %27 = vector.broadcast %cst_19 : f32 to vector<4x128xf32>
    %28 = arith.select %26, %20, %27 : vector<4x128xi1>, vector<4x128xf32>
    %29 = vector.extract_strided_slice %17 {offsets = [0, 126], sizes = [4, 2], strides = [1, 1]} : vector<4x128xf32> to vector<4x2xf32>
    %30 = vector.extract_strided_slice %12 {offsets = [0, 0], sizes = [4, 126], strides = [1, 1]} : vector<4x128xf32> to vector<4x126xf32>
    %31 = tpu.concatenate %29, %30 in 1 : vector<4x2xf32>, vector<4x126xf32> -> vector<4x128xf32>
    %c0_20 = arith.constant 0 : index
    %c0_21 = arith.constant 0 : index
    %32 = vector.load %arg7[%c0_20, %c0_21] : memref<40x128xf32, #tpu.memory_space<vmem>>, vector<4x128xf32>
    tpu.vector_store %arg7[%c0_20, %c0_21], %31 {strides = array<i32>} : memref<40x128xf32, #tpu.memory_space<vmem>>, vector<4x128xf32>,
    %33 = vector.extract_strided_slice %17 {offsets = [0, 127], sizes = [4, 1], strides = [1, 1]} : vector<4x128xf32> to vector<4x1xf32>
    %34 = vector.extract_strided_slice %12 {offsets = [0, 0], sizes = [4, 127], strides = [1, 1]} : vector<4x128xf32> to vector<4x127xf32>
    %35 = tpu.concatenate %33, %34 in 1 : vector<4x1xf32>, vector<4x127xf32> -> vector<4x128xf32>
    %c8 = arith.constant 8 : index
    %c0_22 = arith.constant 0 : index
    %36 = vector.load %arg7[%c8, %c0_22] : memref<40x128xf32, #tpu.memory_space<vmem>>, vector<4x128xf32>
    tpu.vector_store %arg7[%c8, %c0_22], %35 {strides = array<i32>} : memref<40x128xf32, #tpu.memory_space<vmem>>, vector<4x128xf32>,
    %37 = vector.extract_strided_slice %12 {offsets = [0, 1], sizes = [4, 127], strides = [1, 1]} : vector<4x128xf32> to vector<4x127xf32>
    %38 = vector.extract_strided_slice %28 {offsets = [0, 0], sizes = [4, 1], strides = [1, 1]} : vector<4x128xf32> to vector<4x1xf32>
    %39 = tpu.concatenate %37, %38 in 1 : vector<4x127xf32>, vector<4x1xf32> -> vector<4x128xf32>
    %c24 = arith.constant 24 : index
    %c0_23 = arith.constant 0 : index
    %40 = vector.load %arg7[%c24, %c0_23] : memref<40x128xf32, #tpu.memory_space<vmem>>, vector<4x128xf32>
    tpu.vector_store %arg7[%c24, %c0_23], %39 {strides = array<i32>} : memref<40x128xf32, #tpu.memory_space<vmem>>, vector<4x128xf32>,
    %41 = vector.extract_strided_slice %12 {offsets = [0, 2], sizes = [4, 126], strides = [1, 1]} : vector<4x128xf32> to vector<4x126xf32>
    %42 = vector.extract_strided_slice %28 {offsets = [0, 0], sizes = [4, 2], strides = [1, 1]} : vector<4x128xf32> to vector<4x2xf32>
    %43 = tpu.concatenate %41, %42 in 1 : vector<4x126xf32>, vector<4x2xf32> -> vector<4x128xf32>
    %c32 = arith.constant 32 : index
    %c0_24 = arith.constant 0 : index
    %44 = vector.load %arg7[%c32, %c0_24] : memref<40x128xf32, #tpu.memory_space<vmem>>, vector<4x128xf32>
    tpu.vector_store %arg7[%c32, %c0_24], %43 {strides = array<i32>} : memref<40x128xf32, #tpu.memory_space<vmem>>, vector<4x128xf32>,
    %c0_25 = arith.constant 0 : index
    %c0_26 = arith.constant 0 : index
    %45 = vector.load %arg5[%c0_25, %c0_26] : memref<16x40xf32, #tpu.memory_space<vmem>>, vector<16x40xf32>
    %c0_27 = arith.constant 0 : index
    %c0_28 = arith.constant 0 : index
    %46 = vector.load %arg7[%c0_27, %c0_28] : memref<40x128xf32, #tpu.memory_space<vmem>>, vector<40x128xf32>
    %cst_29 = arith.constant dense<0.000000e+00> : vector<16x128xf32>
    %47 = tpu.matmul %45, %46, %cst_29 {dimension_numbers = #tpu.dot_dimension_numbers<[1], [0], [0], [1], [0, 0, 1, 1], [], []>} : vector<16x40xf32>, vector<40x128xf32>, vector<16x128xf32> -> vector<16x128xf32>
    %c0_30 = arith.constant 0 : index
    %c0_31 = arith.constant 0 : index
    %c0_32 = arith.constant 0 : index
    %48 = vector.load %arg6[%c0_30, %c0_31, %c0_32] : memref<1x16x128xf32, #tpu.memory_space<vmem>>, vector<1x16x128xf32>
    %49 = vector.shape_cast %48 : vector<1x16x128xf32> to vector<16x128xf32>
    %50 = vector.shape_cast %47 : vector<16x128xf32> to vector<1x16x128xf32>
    tpu.vector_store %arg6[%c0_30, %c0_31, %c0_32], %50 {strides = array<i32>} : memref<1x16x128xf32, #tpu.memory_space<vmem>>, vector<1x16x128xf32>,
    return
  }
  func.func @transform_0(%arg0: i32, %arg1: i32) -> (i32, i32, i32) {
    %c0_i32 = arith.constant 0 : i32
    %c0_i32_0 = arith.constant 0 : i32
    return %arg0, %c0_i32, %arg1 : i32, i32, i32
  }
  func.func @transform_1(%arg0: i32, %arg1: i32) -> (i32, i32, i32) {
    %c1_i32 = arith.constant 1 : i32
    %0 = arith.muli %arg1, %c1_i32 : i32
    %c1_i32_0 = arith.constant 1 : i32
    %1 = arith.subi %0, %c1_i32_0 : i32
    %c0_i32 = arith.constant 0 : i32
    %2 = arith.maxsi %1, %c0_i32 : i32
    %c0_i32_1 = arith.constant 0 : i32
    %c0_i32_2 = arith.constant 0 : i32
    return %arg0, %c0_i32_1, %2 : i32, i32, i32
  }
  func.func @transform_2(%arg0: i32, %arg1: i32) -> (i32, i32, i32) {
    %c1_i32 = arith.constant 1 : i32
    %0 = arith.addi %arg1, %c1_i32 : i32
    %c1_i32_0 = arith.constant 1 : i32
    %1 = arith.muli %0, %c1_i32_0 : i32
    %c0_i32 = arith.constant 0 : i32
    %2 = arith.minsi %1, %c0_i32 : i32
    %c0_i32_1 = arith.constant 0 : i32
    %c0_i32_2 = arith.constant 0 : i32
    return %arg0, %c0_i32_1, %2 : i32, i32, i32
  }
  func.func @transform_3(%arg0: i32, %arg1: i32) -> (i32, i32) {
    %c0_i32 = arith.constant 0 : i32
    %c0_i32_0 = arith.constant 0 : i32
    %c0_i32_1 = arith.constant 0 : i32
    return %c0_i32, %c0_i32_0 : i32, i32
  }
  func.func @transform_4(%arg0: i32, %arg1: i32) -> (i32, i32, i32) {
    %c0_i32 = arith.constant 0 : i32
    %c0_i32_0 = arith.constant 0 : i32
    return %arg0, %c0_i32, %arg1 : i32, i32, i32
  }
}

</mosaic_0001>

<bundles_post_ra>
// kernel: tpu_custom_call.1
= control target key start
LH: loop header
LB: loop body
LE: loop exit
PB: predicated region body
PF: predicated region fallthrough
CT: control target
= control target key end

     0   :  { %s1270_s0 = inlined_call_operand.hbm [shape: f32[2,4,16], index: 0, kind: input, shape index: {}]   ;;  %s1271_s1 = inlined_call_operand.hbm [shape: f32[2,4,16], index: 1, kind: input, shape index: {}]   ;;  %s1272_s2 = inlined_call_operand.hbm [shape: f32[2,4,16], index: 2, kind: input, shape index: {}]   ;;  %s1273_s3 = inlined_call_operand.hbm [shape: f32[16,40], index: 3, kind: input, shape index: {}]   ;;  %s1274_s4 = inlined_call_operand.hbm [shape: f32[2,16,16], index: 4, kind: output, shape index: {}]  }
   0x1   :  { %1280 = sst [smem:[#allocation19_spill]] %s1271_s1 }
   0x2   :  { %9 = vsyncpa [#allocation4], 0 }
   0x3   :  { %11 = vsyncpa [#allocation4 + $0x1], 0 }
   0x4   :  { %12 = vsyncpa [#allocation7], 0 }
   0x5   :  { %14 = vsyncpa [#allocation7 + $0x1], 0 }
   0x6   :  { %15 = vsyncpa [#allocation10], 0 }
   0x7   :  { %16 = vsyncpa [#allocation5], 0 }
   0x8   :  { %18 = vsyncpa [#allocation5 + $0x1], 0  ;;  %s1038_s15 = smov 0   ;;  %s1040_s16 = smov 0  }
   0x9   :  { %s1042_s17 = smov 0   ;;  %s1044_s18 = smov 0  }
   0xa   :  { %s1046_s19 = smov 0   ;;  %s1048_s20 = smov 0  }
   0xb LB: > { %1281 = sst [smem:[#allocation16_spill]] %s993_s19  ;;  %s36_s21 = sadd.s32 1, %s993_s19  ;;  %s997_s20 = sphi %s1048_s20, %s24_s20   ;;  %s993_s19 = sphi %s1046_s19, %s1300_s19   ;;  %s989_s18 = sphi %s1044_s18, %s1299_s18   ;;  %s985_s17 = sphi %s1042_s17, %s1303_s17   ;;  %s981_s16 = sphi %s1040_s16, %s1302_s16   ;;  %s977_s15 = sphi %s1038_s15, %s1301_s15  }
   0xc   : > { %s45_s22 = sadd.s32 1, %s985_s17  ;;  %p38_p0 = scmp.ge.s32.totalorder %s36_s21, 2 }
   0xd   : > { %p52_p1 = scmp.ne.s32.totalorder %s985_s17, %s981_s16  ;;  %p53_p2 = scmp.eq.s32.totalorder %s997_s20, 0 }
   0xe   : > { %s1305_s21 = smov (%p38_p0, %s36_s21), 0  ;;  %p738_p5 = scmp.lt.s32.totalorder %s997_s20, 2 }
   0xf   : > { %1282 = sst [smem:[#allocation17_spill]] %s1305_s21  ;;  %p54_p4 = por %p53_p2, %p52_p1 }
  0x10   : > { %s40_s23 = ssub.s32 %s993_s19, %s1305_s21  ;;  %s1277_s24 = sand.u32 1, %s985_s17  }
  0x11   : > { %p43_p6 = scmp.eq.s32.totalorder %s40_s23, 0  ;;  %s1085_s25 = sshll.u32 %s1277_s24, 2 }
  0x12   : > { %s1088_s26 = sshll.u32 %s993_s19, 6  ;;  %p1090_p7 = pnand %p738_p5, %p54_p4 }
  0x13   : > { %s1095_s28 = scalar_select %p43_p6, %s985_s17, %s45_s22  }
  0x14   : > { %s231_s29 = sand.u32 1, %s997_s20   ;;  %s1285_s1 = sld [smem:[#allocation19_spill]] }
  0x15   : > { %1284 = sst [smem:[#allocation18_spill]] %s1095_s28  ;;  %s235_s7 = scalar_lea.vmem [#allocation6], %s1085_s25 }
  0x16   : > { %s246_s8 = sshll.u32 %s235_s7, 4  ;;  %s1103_s9 = scalar_lea.sflag [#allocation7], %s231_s29  ;;  %s247_s8 = int_to_ptr.vmem [resolvable:$true] %s246_s8 }
  0x17   : > { %p1276_p8 = pneg %p1090_p7  ;;  %s812_s10 = scalar_lea.vmem %s247_s8, 64 }
  0x18   : > { %p813_p9 = scmp.ne.s32.totalorder %s247_s8, %s812_s10  ;;  %s999_s11 = smov [#allocation6]  }
  0x19   : > { %s817_s12 = sshll.u32 %s999_s11, 4  ;;  %s818_s12 = int_to_ptr.vmem [resolvable:$false] %s817_s12 }
  0x1a   : > { %s244_s6 = scalar_lea.hbm %s1285_s1, %s1088_s26  ;;  %p815_p10 = pnand %p813_p9, %p1276_p8 }
  0x1b   : > { %s819_s13 = scalar_lea.vmem %s818_s12, 128  ;;  %p820_p12 = scmp.lt.s32.totalorder %s247_s8, %s818_s12 }
  0x1c   : > { %p816_p11 = pneg %p815_p10  ;;  %p821_p13 = scmp.lt.s32.totalorder %s819_s13, %s812_s10 }
  0x1e   : > { %p822_p0 = por %p821_p13, %p820_p12 }
  0x20   : > { %p823_p2 = pnand %p822_p0, %p816_p11 }
  0x22   : > { %826 = shalt.err (!%p823_p2)
}
  0x23   : > { %729 = dma.hbm_to_vmem [thread:$0]  (!%p1090_p7), %s244_s6, 64, %s247_s8, %s1103_s9  }
  0x24   : > { %s1114_s14 = sadd.s32 4294967295, %s997_s20   ;;  %s663_s22 = sadd.s32 4294967294, %s997_s20  }
  0x25   : > { %p58_p4 = scmp.ne.s32.totalorder %s981_s16, %s977_s15  ;;  %p1275_p5 = scmp.eq.s32.totalorder %s1114_s14, 0 }
  0x26   : > { %p173_p6 = scmp.eq.s32.totalorder %s1114_s14, 1  ;;  %p179_p9 = scmp.eq.s32.totalorder %s663_s22, 1 }
  0x27   : > { %p664_p10 = scmp.ge.s32.totalorder %s997_s20, 1  ;;  %p1124_p11 = por %p1275_p5, %p58_p4 }
  0x28   : > { %p1131_p12 = por %p173_p6, %p52_p1  ;;  %p1135_p13 = por %p179_p9, %p58_p4 }
  0x29   : > { %p186_p0 = scmp.lt.s32.totalorder %s997_s20, 3  ;;  %s1000_s6 = smov [#allocation9]  }
  0x2a   : > { %s198_s7 = sshll.u32 %s1000_s6, 4  ;;  %s216_s13 = scalar_lea.vmem [#allocation3], %s1085_s25  ;;  %s199_s7 = int_to_ptr.vmem [resolvable:$true] %s198_s7 }
  0x2b   : > { %p1140_p2 = pnand %p664_p10, %p186_p0  ;;  %s224_s22 = sshll.u32 %s216_s13, 4  ;;  %s1157_s22 = int_to_ptr.vmem [resolvable:$true] %s224_s22 }
  0x2c   : > { %s838_s6 = scalar_lea.vmem %s199_s7, 256  ;;  %p846_p0 = scmp.lt.s32.totalorder %s199_s7, %s199_s7 }
  0x2d   : > { %p719_p3 = pneg %p1140_p2  ;;  %p839_p6 = scmp.ne.s32.totalorder %s199_s7, %s838_s6 }
  0x2f   : > { %p1148_p1 = pnand %p719_p3, %p1275_p5  ;;  %p847_p3 = scmp.lt.s32.totalorder %s838_s6, %s838_s6 }
  0x31   : > { %p829_p4 = pneg %p1148_p1  ;;  %p848_p5 = por %p847_p3, %p846_p0 }
  0x33   : > { %p841_p9 = pnand %p839_p6, %p829_p4 }
  0x35   : > { %p842_p10 = pneg %p841_p9 }
  0x37   : > { %p849_p8 = pnand %p848_p5, %p842_p10 }
  0x39   : > { %852 = shalt.err (!%p849_p8)
}
  0x3a   : > { %s1001_s24 = smov 128   ;;  %s1002_s10 = smov 8  }
  0x3b   : > { %722 = dma.hbm_to_vmem [thread:$0]  (!%p1148_p1), %s1273_s3, 256, %s199_s7, [#allocation10], %s1001_s24, %s1001_s24, %s1002_s10  }
  0x3c   : > { %s1291_s12 = sand.u32 1, %s985_s17   ;;  %s866_s21 = scalar_lea.vmem %s1157_s22, 64 }
  0x3d   : > { %s213_s1 = scalar_lea.sflag [#allocation4], %s1291_s12  ;;  %p867_p4 = scmp.ne.s32.totalorder %s1157_s22, %s866_s21 }
  0x3e   : > { %p1292_p5 = pneg %p1090_p7  ;;  %s1003_s6 = smov [#allocation3]  }
  0x3f   : > { %s871_s19 = sshll.u32 %s1003_s6, 4  ;;  %s872_s19 = int_to_ptr.vmem [resolvable:$false] %s871_s19 }
  0x40   : > { %p869_p8 = pnand %p867_p4, %p1292_p5  ;;  %s873_s28 = scalar_lea.vmem %s872_s19, 128 }
  0x41   : > { %p874_p9 = scmp.lt.s32.totalorder %s1157_s22, %s872_s19  ;;  %p875_p10 = scmp.lt.s32.totalorder %s873_s28, %s866_s21 }
  0x42   : > { %p870_p6 = pneg %p869_p8 }
  0x43   : > { %p876_p0 = por %p875_p10, %p874_p9 }
  0x45   : > { %p877_p3 = pnand %p876_p0, %p870_p6 }
  0x47   : > { %880 = shalt.err (!%p877_p3)
}
  0x48   : > { %s1293_s8 = scalar_lea.hbm %s1270_s0, %s1088_s26  ;;  %s266_s19 = scalar_lea.hbm %s1272_s2, %s1088_s26 }
  0x49   : > { %726 = dma.hbm_to_vmem [thread:$0]  (!%p1090_p7), %s1293_s8, 64, %s1157_s22, %s213_s1  }
  0x4a   : > { %s257_s21 = scalar_lea.vmem [#allocation8], %s1085_s25  ;;  %p1294_p4 = pmov %p1292_p5 }
  0x4b   : > { %s268_s28 = sshll.u32 %s257_s21, 4  ;;  %s1004_s13 = smov [#allocation8]   ;;  %s269_s28 = int_to_ptr.vmem [resolvable:$true] %s268_s28 }
  0x4c   : > { %s894_s11 = scalar_lea.vmem %s269_s28, 64  ;;  %s899_s6 = sshll.u32 %s1004_s13, 4  ;;  %s900_s6 = int_to_ptr.vmem [resolvable:$false] %s899_s6 }
  0x4d   : > { %p895_p1 = scmp.ne.s32.totalorder %s269_s28, %s894_s11  ;;  %s901_s24 = scalar_lea.vmem %s900_s6, 128 }
  0x4e   : > { %p902_p6 = scmp.lt.s32.totalorder %s269_s28, %s900_s6  ;;  %p903_p9 = scmp.lt.s32.totalorder %s901_s24, %s894_s11 }
  0x4f   : > { %p897_p5 = pnand %p895_p1, %p1294_p4 }
  0x50   : > { %p904_p10 = por %p903_p9, %p902_p6 }
  0x51   : > { %p898_p8 = pneg %p897_p5 }
  0x53   : > { %p905_p0 = pnand %p904_p10, %p898_p8 }
  0x55   : > { %908 = shalt.err (!%p905_p0)
}
  0x56   : > { %732 = dma.hbm_to_vmem [thread:$0]  (!%p1090_p7), %s266_s19, 64, %s269_s28, %s1103_s9  }
  0x57   : > { %277 = sbr.rel (%p1140_p2) target bundleno = 456 (0x1c8), region = 36  ;;  %s1196_s1 = sand.u32 (!%p1140_p2), 1, %s981_s16  }
  0x58   : > { %s674_s25 = sshll.u32 (!%p1140_p2), %s1196_s1, 2  ;;  %s280_s26 = scalar_lea.sflag (!%p1140_p2), [#allocation4], %s1196_s1 }
  0x59   : > { %s283_s22 = scalar_lea.vmem (!%p1140_p2), [#allocation3], %s674_s25 }
  0x5c   : > { %960 = dma.done.wait (%p1124_p11), %s280_s26, 64  }
  0x5d   : > { %962 = vsyncadd (%p1124_p11), %s280_s26, 4294967232  ;;  %s288_s27 = sand.u32 1, %s1114_s14  }
  0x5e   : > { %s289_s9 = scalar_lea.sflag [#allocation7], %s288_s27 }
  0x5f   : > { %964 = dma.done.wait (%p1124_p11), %s289_s9, 128  }
  0x60   : > { %966 = vsyncadd (%p1124_p11), %s289_s9, 4294967168  ;;  %p1295_p7 = scmp.eq.s32.totalorder %s1114_s14, 0 }
  0x62   : > { %968 = dma.done.wait (%p1295_p7), [#allocation10], 256   ;;  %p1296_p2 = pmov %p1295_p7 }
  0x63   : > { %v357_v0 = vlaneseq  ;;  %v1005_v1 = vmov 0.0   ;;  %s1006_s5 = smov 127   ;;  %s1007_s7 = smov 126   ;;  %v351_v3 = vld [vmem:[%s283_s22] sm:$0xf]  ;;  %v417_v6 = vld [vmem:[#allocation9] sm:$0xff] }
  0x64   : > { %970 = vsyncadd (%p1296_p2), [#allocation10], 4294967040  ;;  %402 = vrot.lane.b32.xlu1 %v1005_v1, %s1006_s5  ;;  %346 = vst [vmem:[#allocation2 + $0x4] sm:$0xf] %v1005_v1  ;;  %411 = vrot.lane.b32.xlu0 %v1005_v1, %s1007_s7  ;;  %s1008_s14 = smov 1   ;;  %vm424_vm1 = vcmask 326656  }
  0x65   : > { %347 = vst [vmem:[#allocation2 + $0xc] sm:$0xf] %v1005_v1  ;;  %348 = vst [vmem:[#allocation2 + $0x14] sm:$0xf] %v1005_v1  ;;  %v358_v2 = vand.u32 127, %v357_v0  ;;  %704 = vmatprep.mubr.msk.f32.mxu0 %vm424_vm1, %v417_v6  ;;  %s1009_s23 = smov 2  }
  0x66   : > { %349 = vst [vmem:[#allocation2 + $0x1c] sm:$0xf] %v1005_v1  ;;  %350 = vst [vmem:[#allocation2 + $0x24] sm:$0xf] %v1005_v1  ;;  %vm405_vm2 = vcmask 1039360   ;;  %vm414_vm3 = vcmask 1031168  }
  0x67   : > { %vm359_vm0 = vcmp.lt.s32.totalorder %v358_v2, 16  ;;  %352 = vst [vmem:[#allocation2 + $0x10] sm:$0xf] %v351_v3  ;;  %vm395_vm4 = vcmask 7168   ;;  %vm386_vm5 = vcmask 15360   ;;  %v418_v24 = vld [vmem:[#allocation9 + $0x8] sm:$0xff] }
  0x68   : > { %v360_v4 = vsel %vm359_vm0, %v351_v3, 0.0  ;;  %s678_s8 = sshll.u32 %s1196_s1, 4  ;;  %s686_s19 = sshll.u32 %s989_s18, 8 }
  0x69   : > { %361 = vst [vmem:[#allocation2 + $0x10] sm:$0xf] %v360_v4  ;;  %s339_s12 = scalar_lea.vmem [#allocation11], %s678_s8  ;;  %s1222_s11 = scalar_lea.hbm %s1274_s4, %s686_s19 }
  0x6a   : > { %s523_s10 = sshll.u32 %s339_s12, 4  ;;  %s509_s13 = scalar_lea.sflag [#allocation5], %s1196_s1  ;;  %s1217_s10 = int_to_ptr.vmem [resolvable:$true] %s523_s10 }
  0x6b   : > { %s909_s6 = scalar_lea.vmem %s1217_s10, 256  ;;  %s1010_s18 = smov [#allocation11]  }
  0x6c   : > { %p910_p11 = scmp.ne.s32.totalorder %s1217_s10, %s909_s6  ;;  %s913_s24 = sshll.u32 %s1010_s18, 4  ;;  %s914_s24 = int_to_ptr.vmem [resolvable:$false] %s913_s24 }
  0x6d   : > { %s915_s25 = scalar_lea.vmem %s914_s24, 512  ;;  %p916_p4 = scmp.lt.s32.totalorder %s1217_s10, %s914_s24 }
  0x6e   : > { %p911_p3 = pnand %p910_p11, %p1131_p12  ;;  %p917_p5 = scmp.lt.s32.totalorder %s915_s25, %s909_s6 }
  0x70   : > { %v362_v5 = vld [vmem:[#allocation2 + $0x10] sm:$0xf]  ;;  %p912_p1 = pneg %p911_p3  ;;  %p918_p8 = por %p917_p5, %p916_p4 }
  0x71   : > { %398 = vrot.lane.b32.xlu1 %v362_v5, %s1006_s5  ;;  %408 = vrot.lane.b32.xlu0 %v362_v5, %s1007_s7  ;;  %v421_v21 = vld [vmem:[#allocation2 + $0x10] sm:$0xff] }
  0x72   : > { %p919_p6 = pnand %p918_p8, %p912_p1 }
  0x75   : > { %392 = vrot.lane.b32.xlu1 %v362_v5, %s1008_s14  ;;  %389 = vrot.lane.b32.xlu0 %v1005_v1, %s1008_s14 }
  0x79   : > { %383 = vrot.lane.b32.xlu1 %v362_v5, %s1009_s23  ;;  %379 = vrot.lane.b32.xlu0 %v1005_v1, %s1009_s23 }
  0xd6   : > { %v403_v7 = vpop.permute.xlu1 %402  ;;  %v412_v8 = vpop.permute.xlu0 %411 }
  0xe3   : > { %v399_v9 = vpop.permute.xlu1 %398  ;;  %v409_v10 = vpop.permute.xlu0 %408 }
  0xe4   : > { %v406_v11 = vsel %vm405_vm2, %v399_v9, %v403_v7  ;;  %v415_v12 = vsel %vm414_vm3, %v409_v10, %v412_v8 }
  0xe5   : > { %407 = vst [vmem:[#allocation2 + $0x18] sm:$0xf] %v406_v11  ;;  %416 = vst [vmem:[#allocation2 + $0x20] sm:$0xf] %v415_v12 }
  0xe7   : > { %v393_v13 = vpop.permute.xlu1 %392  ;;  %v390_v14 = vpop.permute.xlu0 %389 }
  0xe8   : > { %v396_v15 = vsel %vm395_vm4, %v390_v14, %v393_v13 }
  0xe9   : > { %397 = vst [vmem:[#allocation2 + $0x8] sm:$0xf] %v396_v15 }
  0xeb   : > { %v384_v16 = vpop.permute.xlu1 %383  ;;  %v380_v17 = vpop.permute.xlu0 %379 }
  0xec   : > { %v387_v18 = vsel %vm386_vm5, %v380_v17, %v384_v16  ;;  %v423_v19 = vld [vmem:[#allocation2 + $0x20] sm:$0xff]  ;;  %v422_v20 = vld [vmem:[#allocation2 + $0x18] sm:$0xff] }
  0xed   : > { %388 = vst [vmem:[#allocation2] sm:$0xf] %v387_v18  ;;  %694 = vmatprep.subr.mxu0 %v423_v19 }
  0xee   : > { %695 = vmatpush3.msra.mxu0 %v423_v19 }
  0xef   : > { %696 = vmatprep.subr.mxu0 %v422_v20 }
  0xf0   : > { %697 = vmatpush3.msra.mxu0 %v422_v20  ;;  %v420_v22 = vld [vmem:[#allocation2 + $0x8] sm:$0xff] }
  0xf1   : > { %698 = vmatprep.subr.mxu0 %v421_v21 }
  0xf2   : > { %699 = vmatpush3.msra.mxu0 %v421_v21 }
  0xf3   : > { %700 = vmatprep.subr.mxu0 %v420_v22 }
  0xf4   : > { %701 = vmatpush3.msra.mxu0 %v420_v22  ;;  %v419_v23 = vld [vmem:[#allocation2] sm:$0xff] }
  0xf5   : > { %702 = vmatprep.subr.mxu0 %v419_v23 }
  0xf6   : > { %703 = vmatpush3.msra.mxu0 %v419_v23 }
  0xf7   : > { %705 = vmatmul.mubr.msk.f32.vlgmr.msra.gmra.mxu0 %vm424_vm1, %v418_v24 }
 0x1b7   : > { %v706_v25 = vpop.f32.mrf.mxu0 }
 0x1b8   : > { %507 = vst [vmem:[%s339_s12 + $0x8] sm:$0xff] %v706_v25 }
 0x1b9   : > { %v497_v26 = vpop.f32.mrf.mxu0 }
 0x1ba   : > { %506 = vst [vmem:[%s339_s12] sm:$0xff] %v497_v26 }
 0x1bb   : > { %922 = shalt.err (!%p919_p6)
}
 0x1bc   : > { %s923_s26 = scalar_lea.hbm %s1222_s11, 256  ;;  %s927_s9 = scalar_lea.hbm %s1274_s4, 512 }
 0x1bd   : > { %p924_p9 = scmp.ne.s32.totalorder %s1222_s11, %s923_s26  ;;  %p928_p7 = scmp.lt.s32.totalorder %s1222_s11, %s1274_s4 }
 0x1be   : > { %p929_p2 = scmp.lt.s32.totalorder %s927_s9, %s923_s26 }
 0x1bf   : > { %p925_p10 = pnand %p924_p9, %p1131_p12 }
 0x1c0   : > { %p930_p11 = por %p929_p2, %p928_p7 }
 0x1c1   : > { %p926_p0 = pneg %p925_p10 }
 0x1c3   : > { %p931_p3 = pnand %p930_p11, %p926_p0 }
 0x1c5   : > { %934 = shalt.err (!%p931_p3)
}
 0x1c6   : > { %s1011_s14 = smov 128   ;;  %s1012_s23 = smov 8  }
 0x1c7   : > { %717 = dma.vmem_to_hbm [thread:$0]  (%p1131_p12), %s1217_s10, 256, %s1222_s11, %s509_s13, %s1011_s14, %s1011_s14, %s1012_s23  }
 0x1c8 PF: > { %s538_s8 = sand.u32 1, %s977_s15   ;;  %p1297_p1 = scmp.ge.s32.totalorder %s997_s20, 2 }
 0x1c9   : > { %s539_s12 = scalar_lea.sflag [#allocation5], %s538_s8 }
 0x1ca   : > { %p734_p4 = pnand %p1297_p1, %p1135_p13 }
 0x1cc   : > { %p735_p5 = pneg %p734_p4 }
 0x1ce   : > { %972 = dma.done.wait (%p735_p5), %s539_s12, 256  }
 0x1cf   : > { %974 = vsyncadd (%p735_p5), %s539_s12, 4294967040  ;;  %s24_s20 = sadd.s32 1, %s997_s20   ;;  %s1298_s29 = sld [smem:[#allocation18_spill]] }
 0x1d0   : > { %p21_p8 = scmp.ge.s32.totalorder %s24_s20, 4   ;;  %s1299_s18 = sld [smem:[#allocation16_spill]] }
 0x1d1   : > { %s1300_s19 = sld [smem:[#allocation17_spill]]  ;;  %s1301_s15 = smov %s981_s16 }
 0x1d2   : > { %s1302_s16 = smov %s985_s17  ;;  %23 = sbr.rel (!%p21_p8) target bundleno = 11 (0xb), region = 113 }
 0x1d5   : > { %s1303_s17 = smov %s1298_s29 }
 0x1d7   :  { %544 = vsyncpa [#allocation4], 1 }
 0x1d8   :  { %546 = vsyncpa [#allocation4 + $0x1], 1 }
 0x1d9   :  { %547 = vsyncpa [#allocation7], 1 }
 0x1da   :  { %549 = vsyncpa [#allocation7 + $0x1], 1 }
 0x1db   :  { %550 = vsyncpa [#allocation10], 1 }
 0x1dc   :  { %551 = vsyncpa [#allocation5], 1 }
 0x1dd   :  { %553 = vsyncpa [#allocation5 + $0x1], 1 }

</bundles_post_ra>
